<compile_context>
chip_gen: v5e
topology: v5e:2x2
jax: 0.10.0
libtpu: 0.0.40
codegen_flags: <defaults>
</compile_context>

<pallas_src>
import math

import jax
import jax.numpy as jnp
from jax import lax
from jax.experimental import pallas as pl
from jax.experimental.pallas import tpu as pltpu


def _round_up(v, mult):
    return ((v + mult - 1) // mult) * mult


_HAS_BUFFERED = hasattr(pl, "Buffered")


def _block_spec(shape, index_map, *, single_buffer=False):
    """BlockSpec; constant-index operands get a single pipeline buffer."""
    if single_buffer and _HAS_BUFFERED:
        try:
            return pl.BlockSpec(shape, index_map, pipeline_mode=pl.Buffered(1))
        except TypeError:                      # older jax without pipeline_mode
            pass
    return pl.BlockSpec(shape, index_map)


def _make_kernel(acc_in_out):
    inv_sqrt2 = 1.0 / math.sqrt(2.0)

    def kernel(x_ref, w_ref, b_ref, g_ref, beta_ref, o_ref, *scratch):
        acc_ref = o_ref if acc_in_out else scratch[0]
        k_id = pl.program_id(1)

        @pl.when(k_id == 0)
        def _init():
            # Fold the bias into the accumulator init (saves one epilogue pass).
            acc_ref[...] = jnp.broadcast_to(
                b_ref[...].astype(jnp.float32), acc_ref.shape)

        # MXU matmul in the operands' native dtype, f32 accumulation.
        # Weight block is [N, K-tile]; contract on K (trans_b path on the MXU).
        acc_ref[...] += lax.dot_general(
            x_ref[...], w_ref[...],
            dimension_numbers=(((1,), (1,)), ((), ())),
            preferred_element_type=jnp.float32)

        @pl.when(k_id == pl.num_programs(1) - 1)
        def _finalize():
            h = acc_ref[...]
            # Exact (erf-based) GELU, matching nn.GELU() default.
            h = 0.5 * h * (1.0 + lax.erf(h * inv_sqrt2))
            # LayerNorm over the feature axis, eps = 1e-5 (PyTorch default).
            mean = jnp.mean(h, axis=-1, keepdims=True)
            centered = h - mean
            var = jnp.mean(centered * centered, axis=-1, keepdims=True)
            normed = centered * lax.rsqrt(var + 1e-5)
            out = (normed * g_ref[...].astype(jnp.float32)
                   + beta_ref[...].astype(jnp.float32))
            o_ref[...] = out.astype(o_ref.dtype)

    return kernel


def dense_layer(x, weight, bias, gamma, beta, *,
                tile_m=None, tile_k=None, max_resident_weight_bytes=None):
    """Fused Linear(+bias) -> GELU -> LayerNorm.

    x:      [..., in_features]
    weight: [out_features, in_features]   (PyTorch nn.Linear layout, used as-is)
    bias, gamma, beta: [out_features]
    """
    in_features = x.shape[-1]
    n = weight.shape[0]
    lead_shape = x.shape[:-1]
    out_dtype = x.dtype

    x2d = x.reshape(-1, in_features)
    m, k = x2d.shape

    x_item = x2d.dtype.itemsize
    w_item = weight.dtype.itemsize
    o_item = jnp.dtype(out_dtype).itemsize

    # ---- chip-aware VMEM budget -------------------------------------------
    try:
        vmem_cap = int(pltpu.get_tpu_info().vmem_capacity_bytes)
    except Exception:                                    # conservative default
        vmem_cap = 64 << 20
    vmem_budget = max(vmem_cap - (8 << 20), 24 << 20)    # leave headroom
    small_vmem = vmem_cap <= (64 << 20)                  # v7x-class core

    try:
        device_kind = jax.devices()[0].device_kind.lower()
    except Exception:
        device_kind = ""
    is_v5 = "v5" in device_kind

    # ---- K schedule: keep the weight resident (single-buffered) when small,
    # otherwise stream K tiles over a K zero-padded to a multiple of 128. ----
    w_bytes = n * k * w_item
    resident_thresh = (min(vmem_budget // 5, 16 << 20)
                       if max_resident_weight_bytes is None
                       else max_resident_weight_bytes)
    resident = w_bytes <= resident_thresh

    if resident:
        k_pad, tk, k_steps = k, k, 1
    else:
        k_pad = _round_up(k, 128)
        if tile_k is not None:
            tk = max(128, (min(tile_k, k_pad) // 128) * 128)
        else:
            # v5e: fewer/larger K steps (slow MXU, plenty of VMEM); others: 512.
            tk = min(1024 if is_v5 else 512, k_pad)
        while k_pad % tk != 0:
            tk -= 128
        k_steps = k_pad // tk
        if k_pad > k:          # zeros contribute nothing to the contraction
            x2d = jnp.pad(x2d, ((0, 0), (0, k_pad - k)))
            weight = jnp.pad(weight, ((0, 0), (0, k_pad - k)))

    # ---- accumulator: reuse the f32 output block when possible (saves VMEM).
    acc_in_out = jnp.dtype(out_dtype) == jnp.float32

    # ---- M tile: dtype sublane pack, chip roofline, >=2 tiles on multi-core.
    packing = {1: 32, 2: 16}.get(x_item, 8)
    if tile_m is not None:
        tm_target = tile_m
    elif resident or is_v5:
        tm_target = 512
    else:
        # streamed-weight arithmetic intensity ~ tm FLOP/byte; v6e/v7x want more.
        tm_target = 1024
    tm = _round_up(min(tm_target, _round_up(m, packing)), packing)
    if small_vmem and m > packing:
        # v7x has 2 TensorCores: make sure the "parallel" M axis has >= 2 tiles.
        tm = min(tm, _round_up(-(-m // 2), packing))
    tm = max(tm, packing)

    def footprint(tm_, tk_):
        fp = 2 * tm_ * tk_ * x_item                        # x tiles (dbl-buffered)
        fp += (1 if resident else 2) * tk_ * n * w_item    # weight tile(s)
        fp += 2 * tm_ * n * o_item                         # output tiles
        if not acc_in_out:
            fp += tm_ * n * 4                              # f32 accumulator
        fp += 4 * n * 4                                    # bias / gamma / beta
        return fp

    while tm > packing and footprint(tm, tk) > vmem_budget:
        tm -= packing
    if (not resident) and footprint(tm, tk) > vmem_budget and tk > 128:
        tk = 128                                           # last-ditch smallest K tile
        k_steps = k_pad // tk
        while tm > packing and footprint(tm, tk) > vmem_budget:
            tm -= packing

    est = footprint(tm, tk)
    vmem_limit = int(min(max(est + (2 << 20), 24 << 20), vmem_cap - (4 << 20)))

    # ---- grid & specs -------------------------------------------------------
    grid = (pl.cdiv(m, tm), k_steps)

    if k_steps > 1:
        def k_index(i, kk):        # serpentine K order per M-tile
            return kk + (i % 2) * (k_steps - 1 - 2 * kk)
    else:
        def k_index(i, kk):
            return kk

    b_row = bias.reshape(1, n)
    g_row = gamma.reshape(1, n)
    be_row = beta.reshape(1, n)

    in_specs = [
        pl.BlockSpec((tm, tk), lambda i, kk: (i, k_index(i, kk))),       # x
        _block_spec((n, tk), lambda i, kk: (0, k_index(i, kk)),          # weight [N,K]
                    single_buffer=resident),
        _block_spec((1, n), lambda i, kk: (0, 0), single_buffer=True),   # bias
        _block_spec((1, n), lambda i, kk: (0, 0), single_buffer=True),   # ln gamma
        _block_spec((1, n), lambda i, kk: (0, 0), single_buffer=True),   # ln beta
    ]
    out_spec = pl.BlockSpec((tm, n), lambda i, kk: (i, 0))
    scratch = [] if acc_in_out else [pltpu.VMEM((tm, n), jnp.float32)]

    out = pl.pallas_call(
        _make_kernel(acc_in_out),
        out_shape=jax.ShapeDtypeStruct((m, n), out_dtype),
        grid_spec=pltpu.PrefetchScalarGridSpec(
            num_scalar_prefetch=0,
            grid=grid,
            in_specs=in_specs,
            out_specs=out_spec,
            scratch_shapes=scratch),
        compiler_params=pltpu.CompilerParams(
            dimension_semantics=("parallel", "arbitrary"),
            vmem_limit_bytes=vmem_limit),
    )(x2d, weight, b_row, g_row, be_row)

    return out.reshape(*lead_shape, n)


def _reference(x, weight, bias, gamma, beta):
    h = (jnp.einsum("...k,nk->...n", x.astype(jnp.float32),
                    weight.astype(jnp.float32))
         + bias.astype(jnp.float32))
    h = 0.5 * h * (1.0 + lax.erf(h / jnp.sqrt(2.0)))
    mean = jnp.mean(h, axis=-1, keepdims=True)
    var = jnp.mean((h - mean) ** 2, axis=-1, keepdims=True)
    return ((h - mean) * lax.rsqrt(var + 1e-5) * gamma.astype(jnp.float32)
            + beta.astype(jnp.float32))


if __name__ == "__main__":
    key = jax.random.PRNGKey(0)
    k_x, k_w, k_b, k_x2, k_w2, k_b2 = jax.random.split(key, 6)

    # --- test 1: f32, resident weight, accumulate-directly-into-output path --
    batch, seq = 2, 8
    in_features, out_features = 128, 128
    x = jax.random.normal(k_x, (batch, seq, in_features), dtype=jnp.float32)
    bound = 1.0 / math.sqrt(in_features)
    weight = jax.random.uniform(k_w, (out_features, in_features),
                                minval=-bound, maxval=bound, dtype=jnp.float32)
    bias = jax.random.uniform(k_b, (out_features,),
                              minval=-bound, maxval=bound, dtype=jnp.float32)
    gamma = jnp.ones((out_features,), jnp.float32)    # nn.LayerNorm defaults
    beta = jnp.zeros((out_features,), jnp.float32)

    out = jax.block_until_ready(dense_layer(x, weight, bias, gamma, beta))
    ref = _reference(x, weight, bias, gamma, beta)
    assert out.shape == (batch, seq, out_features)
    assert jnp.allclose(out, ref, atol=2e-4, rtol=2e-4), "f32 mismatch vs reference"

    # --- test 2: bf16, streamed + zero-padded K, serpentine K reduction ------
    in2, out2 = 200, 128
    x2 = jax.random.normal(k_x2, (batch, seq, in2), dtype=jnp.bfloat16)
    bound2 = 1.0 / math.sqrt(in2)
    w2 = jax.random.uniform(k_w2, (out2, in2), minval=-bound2, maxval=bound2,
                            dtype=jnp.float32).astype(jnp.bfloat16)
    b2 = jax.random.uniform(k_b2, (out2,), minval=-bound2, maxval=bound2,
                            dtype=jnp.float32).astype(jnp.bfloat16)
    g2 = jnp.ones((out2,), jnp.bfloat16)
    be2 = jnp.zeros((out2,), jnp.bfloat16)

    out2_arr = jax.block_until_ready(
        dense_layer(x2, w2, b2, g2, be2, tile_k=128, max_resident_weight_bytes=0))
    ref2 = _reference(x2, w2, b2, g2, be2)
    assert out2_arr.shape == (batch, seq, out2)
    assert jnp.allclose(out2_arr.astype(jnp.float32), ref2,
                        atol=4e-2, rtol=4e-2), "bf16 mismatch vs reference"

    print("KERNEL_OK")
</pallas_src>

<mosaic_0001>
module attributes {stable_mosaic.version = 11 : i64} {
  func.func @kernel(%arg0: i32, %arg1: i32, %arg2: memref<8x128xf32, #tpu.memory_space<vmem>>, %arg3: memref<128x128xf32, #tpu.memory_space<vmem>>, %arg4: memref<1x128xf32, #tpu.memory_space<vmem>>, %arg5: memref<1x128xf32, #tpu.memory_space<vmem>>, %arg6: memref<1x128xf32, #tpu.memory_space<vmem>>, %arg7: memref<8x128xf32, #tpu.memory_space<vmem>>) attributes {dimension_semantics = [#tpu.dimension_semantics<parallel>, #tpu.dimension_semantics<arbitrary>], iteration_bounds = array<i64: 2, 1>, scalar_prefetch = 0 : i64, scratch_operands = 0 : i64, tpu.core_type = #tpu.core_type<tc>, window_params = [{transform_indices = @transform_0, window_bounds = array<i64: 8, 128>}, {pipeline_mode = #tpu.pipeline_mode<synchronous>, transform_indices = @transform_1, window_bounds = array<i64: 128, 128>}, {pipeline_mode = #tpu.pipeline_mode<synchronous>, transform_indices = @transform_2, window_bounds = array<i64: 1, 128>}, {pipeline_mode = #tpu.pipeline_mode<synchronous>, transform_indices = @transform_3, window_bounds = array<i64: 1, 128>}, {pipeline_mode = #tpu.pipeline_mode<synchronous>, transform_indices = @transform_4, window_bounds = array<i64: 1, 128>}, {transform_indices = @transform_5, window_bounds = array<i64: 8, 128>}]} {
    %c0_i32 = arith.constant 0 : i32
    %0 = arith.cmpi eq, %arg1, %c0_i32 : i32
    %1 = arith.extui %0 : i1 to i32
    %c0_i32_0 = arith.constant 0 : i32
    %2 = arith.cmpi ne, %1, %c0_i32_0 : i32
    scf.if %2 {
      %c0_10 = arith.constant 0 : index
      %c0_11 = arith.constant 0 : index
      %12 = vector.load %arg4[%c0_10, %c0_11] : memref<1x128xf32, #tpu.memory_space<vmem>>, vector<1x128xf32>
      %13 = vector.shape_cast %12 : vector<1x128xf32> to vector<1x128xf32>
      %14 = vector.broadcast %13 : vector<1x128xf32> to vector<8x128xf32>
      %c0_12 = arith.constant 0 : index
      %c0_13 = arith.constant 0 : index
      %15 = vector.load %arg7[%c0_12, %c0_13] : memref<8x128xf32, #tpu.memory_space<vmem>>, vector<8x128xf32>
      tpu.vector_store %arg7[%c0_12, %c0_13], %14 {strides = array<i32>} : memref<8x128xf32, #tpu.memory_space<vmem>>, vector<8x128xf32>,
    } else {
    }
    %c0 = arith.constant 0 : index
    %c0_1 = arith.constant 0 : index
    %3 = vector.load %arg7[%c0, %c0_1] : memref<8x128xf32, #tpu.memory_space<vmem>>, vector<8x128xf32>
    %c0_2 = arith.constant 0 : index
    %c0_3 = arith.constant 0 : index
    %4 = vector.load %arg2[%c0_2, %c0_3] : memref<8x128xf32, #tpu.memory_space<vmem>>, vector<8x128xf32>
    %c0_4 = arith.constant 0 : index
    %c0_5 = arith.constant 0 : index
    %5 = vector.load %arg3[%c0_4, %c0_5] : memref<128x128xf32, #tpu.memory_space<vmem>>, vector<128x128xf32>
    %cst = arith.constant dense<0.000000e+00> : vector<8x128xf32>
    %6 = tpu.matmul %4, %5, %cst {dimension_numbers = #tpu.dot_dimension_numbers<[1], [1], [0], [0], [0, 0, 1, 0], [], []>} : vector<8x128xf32>, vector<128x128xf32>, vector<8x128xf32> -> vector<8x128xf32>
    %7 = arith.addf %3, %6 : vector<8x128xf32>
    %c0_6 = arith.constant 0 : index
    %c0_7 = arith.constant 0 : index
    %8 = vector.load %arg7[%c0_6, %c0_7] : memref<8x128xf32, #tpu.memory_space<vmem>>, vector<8x128xf32>
    tpu.vector_store %arg7[%c0_6, %c0_7], %7 {strides = array<i32>} : memref<8x128xf32, #tpu.memory_space<vmem>>, vector<8x128xf32>,
    %c0_i32_8 = arith.constant 0 : i32
    %9 = arith.cmpi eq, %arg1, %c0_i32_8 : i32
    %10 = arith.extui %9 : i1 to i32
    %c0_i32_9 = arith.constant 0 : i32
    %11 = arith.cmpi ne, %10, %c0_i32_9 : i32
    scf.if %11 {
      %c0_10 = arith.constant 0 : index
      %c0_11 = arith.constant 0 : index
      %12 = vector.load %arg7[%c0_10, %c0_11] : memref<8x128xf32, #tpu.memory_space<vmem>>, vector<8x128xf32>
      %cst_12 = arith.constant 5.000000e-01 : f32
      %13 = vector.broadcast %cst_12 : f32 to vector<8x128xf32>
      %14 = arith.mulf %13, %12 : vector<8x128xf32>
      %cst_13 = arith.constant 0.707106769 : f32
      %15 = vector.broadcast %cst_13 : f32 to vector<8x128xf32>
      %16 = arith.mulf %12, %15 : vector<8x128xf32>
      %17 = math.erf %16 : vector<8x128xf32>
      %cst_14 = arith.constant 1.000000e+00 : f32
      %18 = vector.broadcast %cst_14 : f32 to vector<8x128xf32>
      %19 = arith.addf %18, %17 : vector<8x128xf32>
      %20 = arith.mulf %14, %19 : vector<8x128xf32>
      %cst_15 = arith.constant dense<0.000000e+00> : vector<8xf32>
      %21 = vector.multi_reduction <add>, %20, %cst_15 [1] : vector<8x128xf32> to vector<8xf32>
      %22 = vector.shape_cast %21 : vector<8xf32> to vector<8x1xf32>
      %cst_16 = arith.constant 1.280000e+02 : f32
      %23 = vector.broadcast %cst_16 : f32 to vector<8x1xf32>
      %24 = arith.divf %22, %23 : vector<8x1xf32>
      %25 = vector.broadcast %24 : vector<8x1xf32> to vector<8x128xf32>
      %26 = arith.subf %20, %25 : vector<8x128xf32>
      %27 = arith.mulf %26, %26 : vector<8x128xf32>
      %cst_17 = arith.constant dense<0.000000e+00> : vector<8xf32>
      %28 = vector.multi_reduction <add>, %27, %cst_17 [1] : vector<8x128xf32> to vector<8xf32>
      %29 = vector.shape_cast %28 : vector<8xf32> to vector<8x1xf32>
      %cst_18 = arith.constant 1.280000e+02 : f32
      %30 = vector.broadcast %cst_18 : f32 to vector<8x1xf32>
      %31 = arith.divf %29, %30 : vector<8x1xf32>
      %cst_19 = arith.constant 9.99999974E-6 : f32
      %32 = vector.broadcast %cst_19 : f32 to vector<8x1xf32>
      %33 = arith.addf %31, %32 : vector<8x1xf32>
      %34 = math.rsqrt %33 : vector<8x1xf32>
      %35 = vector.broadcast %34 : vector<8x1xf32> to vector<8x128xf32>
      %36 = arith.mulf %26, %35 : vector<8x128xf32>
      %c0_20 = arith.constant 0 : index
      %c0_21 = arith.constant 0 : index
      %37 = vector.load %arg5[%c0_20, %c0_21] : memref<1x128xf32, #tpu.memory_space<vmem>>, vector<1x128xf32>
      %38 = vector.broadcast %37 : vector<1x128xf32> to vector<8x128xf32>
      %39 = arith.mulf %36, %38 : vector<8x128xf32>
      %c0_22 = arith.constant 0 : index
      %c0_23 = arith.constant 0 : index
      %40 = vector.load %arg6[%c0_22, %c0_23] : memref<1x128xf32, #tpu.memory_space<vmem>>, vector<1x128xf32>
      %41 = vector.broadcast %40 : vector<1x128xf32> to vector<8x128xf32>
      %42 = arith.addf %39, %41 : vector<8x128xf32>
      %c0_24 = arith.constant 0 : index
      %c0_25 = arith.constant 0 : index
      %43 = vector.load %arg7[%c0_24, %c0_25] : memref<8x128xf32, #tpu.memory_space<vmem>>, vector<8x128xf32>
      tpu.vector_store %arg7[%c0_24, %c0_25], %42 {strides = array<i32>} : memref<8x128xf32, #tpu.memory_space<vmem>>, vector<8x128xf32>,
    } else {
    }
    return
  }
  func.func @transform_0(%arg0: i32, %arg1: i32) -> (i32, i32) {
    %c0_i32 = arith.constant 0 : i32
    return %arg0, %arg1 : i32, i32
  }
  func.func @transform_1(%arg0: i32, %arg1: i32) -> (i32, i32) {
    %c0_i32 = arith.constant 0 : i32
    %c0_i32_0 = arith.constant 0 : i32
    return %c0_i32, %arg1 : i32, i32
  }
  func.func @transform_2(%arg0: i32, %arg1: i32) -> (i32, i32) {
    %c0_i32 = arith.constant 0 : i32
    %c0_i32_0 = arith.constant 0 : i32
    %c0_i32_1 = arith.constant 0 : i32
    return %c0_i32, %c0_i32_0 : i32, i32
  }
  func.func @transform_3(%arg0: i32, %arg1: i32) -> (i32, i32) {
    %c0_i32 = arith.constant 0 : i32
    %c0_i32_0 = arith.constant 0 : i32
    %c0_i32_1 = arith.constant 0 : i32
    return %c0_i32, %c0_i32_0 : i32, i32
  }
  func.func @transform_4(%arg0: i32, %arg1: i32) -> (i32, i32) {
    %c0_i32 = arith.constant 0 : i32
    %c0_i32_0 = arith.constant 0 : i32
    %c0_i32_1 = arith.constant 0 : i32
    return %c0_i32, %c0_i32_0 : i32, i32
  }
  func.func @transform_5(%arg0: i32, %arg1: i32) -> (i32, i32) {
    %c0_i32 = arith.constant 0 : i32
    %c0_i32_0 = arith.constant 0 : i32
    return %arg0, %c0_i32 : i32, i32
  }
}

</mosaic_0001>

<bundles_post_ra>
// kernel: tpu_custom_call.1
= control target key start
LH: loop header
LB: loop body
LE: loop exit
PB: predicated region body
PF: predicated region fallthrough
CT: control target
= control target key end

     0   :  { %10 = vsyncpa [#allocation3], 0  ;;  %s965_s0 = inlined_call_operand.hbm [shape: f32[16,128], index: 0, kind: input, shape index: {}]   ;;  %s966_s1 = inlined_call_operand.hbm [shape: f32[128,128], index: 1, kind: input, shape index: {}]   ;;  %s967_s2 = inlined_call_operand.vmem [shape: f32[1,128], index: 2, kind: input, shape index: {}]   ;;  %s968_s3 = inlined_call_operand.vmem [shape: f32[1,128], index: 3, kind: input, shape index: {}]   ;;  %s969_s4 = inlined_call_operand.vmem [shape: f32[1,128], index: 4, kind: input, shape index: {}]   ;;  %s970_s5 = inlined_call_operand.hbm [shape: f32[16,128], index: 5, kind: output, shape index: {}]  }
   0x1   :  { %12 = vsyncpa [#allocation3 + $0x1], 0 }
   0x2   :  { %13 = vsyncpa [#allocation6], 0 }
   0x3   :  { %14 = vsyncpa [#allocation4], 0 }
   0x4   :  { %16 = vsyncpa [#allocation4 + $0x1], 0  ;;  %s806_s18 = smov 0   ;;  %s808_s19 = smov 0  }
   0x5   :  { %s810_s20 = smov 0   ;;  %s812_s21 = smov 0  }
   0x6   :  { %s814_s22 = smov 0   ;;  %s816_s23 = smov 0  }
   0x7 LB: > { %s523_s24 = sadd.s32 4294967295, %s770_s23   ;;  %p525_p0 = scmp.ge.s32.totalorder %s770_s23, 1  ;;  %s770_s23 = sphi %s816_s23, %s22_s23   ;;  %s766_s22 = sphi %s814_s22, %s981_s22   ;;  %s762_s21 = sphi %s812_s21, %s980_s21   ;;  %s758_s20 = sphi %s810_s20, %s979_s20   ;;  %s754_s19 = sphi %s808_s19, %s978_s19   ;;  %s750_s18 = sphi %s806_s18, %s977_s18  }
   0x8   : > { %p838_p1 = scmp.eq.s32.totalorder %s523_s24, 0  ;;  %p182_p2 = scmp.lt.s32.totalorder %s770_s23, 3 }
   0x9   : > { %s195_s28 = sshll.u32 %s966_s1, 4  ;;  %s772_s30 = smov [#allocation5]   ;;  %s196_s28 = int_to_ptr.hbm [resolvable:$true] %s195_s28 }
   0xa   : > { %p846_p3 = pnand %p525_p0, %p182_p2  ;;  %s197_s6 = sshll.u32 %s772_s30, 4  ;;  %s198_s6 = int_to_ptr.vmem [resolvable:$true] %s197_s6 }
   0xb   : > { %p527_p6 = scmp.ge.s32.totalorder %s770_s23, 2  ;;  %s773_s7 = smov 128  }
   0xc   : > { %p547_p4 = pneg %p846_p3  ;;  %s774_s8 = smov 8  }
   0xd   : > { %s524_s9 = sadd.s32 4294967294, %s770_s23   ;;  %s34_s10 = sadd.s32 1, %s766_s22 }
   0xe   : > { %p548_p5 = pnand %p547_p4, %p838_p1  ;;  %s43_s11 = sadd.s32 1, %s758_s20 }
   0xf   : > { %p36_p7 = scmp.ge.s32.totalorder %s34_s10, 2  ;;  %p50_p8 = scmp.ne.s32.totalorder %s758_s20, %s754_s19 }
  0x10   : > { %550 = dma.hbm_to_vmem [thread:$0]  (!%p548_p5), %s196_s28, 2048, %s198_s6, [#allocation6], %s773_s7, %s773_s7, %s774_s8  }
  0x11   : > { %p51_p9 = scmp.eq.s32.totalorder %s770_s23, 0  ;;  %p56_p10 = scmp.ne.s32.totalorder %s754_s19, %s750_s18 }
  0x12   : > { %s983_s10 = smov (%p36_p7, %s34_s10), 0  ;;  %p169_p13 = scmp.eq.s32.totalorder %s523_s24, 1 }
  0x13   : > { %p865_p11 = por %p51_p9, %p50_p8  ;;  %p871_p12 = por %p838_p1, %p56_p10 }
  0x14   : > { %s38_s14 = ssub.s32 %s766_s22, %s983_s10  ;;  %p175_p2 = scmp.eq.s32.totalorder %s524_s9, 1 }
  0x15   : > { %p41_p0 = scmp.eq.s32.totalorder %s38_s14, 0  ;;  %p877_p4 = por %p169_p13, %p50_p8 }
  0x16   : > { %p560_p5 = scmp.lt.s32.totalorder %s770_s23, 2  ;;  %p885_p7 = por %p175_p2, %p56_p10 }
  0x17   : > { %s883_s16 = scalar_select %p41_p0, %s758_s20, %s43_s11  }
  0x18   : > { %s220_s26 = sand.u32 1, %s758_s20   ;;  %s529_s28 = sshll.u32 %s766_s22, 3 }
  0x19   : > { %s528_s27 = sshll.u32 %s220_s26, 3  ;;  %s229_s24 = scalar_lea.hbm %s965_s0, %s529_s28 }
  0x1a   : > { %s224_s7 = scalar_lea.vmem [#allocation2], %s528_s27  ;;  %s231_s9 = sshll.u32 %s229_s24, 4  ;;  %s232_s9 = int_to_ptr.hbm [resolvable:$true] %s231_s9 }
  0x1b   : > { %s233_s8 = sshll.u32 %s224_s7, 4  ;;  %p552_p8 = pnand %p560_p5, %p865_p11  ;;  %s234_s8 = int_to_ptr.vmem [resolvable:$true] %s233_s8 }
  0x1c   : > { %s221_s11 = scalar_lea.sflag [#allocation3], %s220_s26  ;;  %242 = sbr.rel (%p846_p3) target bundleno = 548 (0x224), region = 40 }
  0x1d   : > { %554 = dma.hbm_to_vmem [thread:$0]  (!%p552_p8), %s232_s9, 128, %s234_s8, %s221_s11  }
  0x1e   : > { %s899_s14 = sand.u32 (!%p846_p3), 1, %s754_s19  }
  0x1f   : > { %s531_s28 = sshll.u32 (!%p846_p3), %s899_s14, 3  ;;  %s245_s27 = scalar_lea.sflag (!%p846_p3), [#allocation3], %s899_s14 }
  0x20   : > { %s905_s30 = scalar_lea.vmem (!%p846_p3), [#allocation2], %s531_s28 }
  0x21   : > { %737 = dma.done.wait (%p871_p12), %s245_s27, 128  }
  0x22   : > { %739 = vsyncadd (%p871_p12), %s245_s27, 4294967168 }
  0x23   : > { %741 = dma.done.wait (%p838_p1), [#allocation6], 2048  }
  0x24   : > { %743 = vsyncadd (%p838_p1), [#allocation6], 4294965248  ;;  %v307_v0 = vld [vmem:[#allocation5 + $0x78] sm:$0xff]  ;;  %v306_v1 = vld [vmem:[#allocation5 + $0x70] sm:$0xff]  ;;  %v775_v59 = vmov 128.0   ;;  %s536_s12 = sshll.u32 %s762_s21, 3 }
  0x25   : > { %308 = vmatpush.xpose.msra.mxu0 %v307_v0  ;;  %v305_v2 = vld [vmem:[#allocation5 + $0x68] sm:$0xff]  ;;  %v304_v3 = vld [vmem:[#allocation5 + $0x60] sm:$0xff]  ;;  %v303_v4 = vld [vmem:[#allocation5 + $0x58] sm:$0xff]  ;;  %s427_s7 = scalar_lea.hbm %s970_s5, %s536_s12  ;;  %s280_s21 = scalar_lea.vmem [#allocation7], %s531_s28 }
  0x26   : > { %v302_v5 = vld [vmem:[#allocation5 + $0x50] sm:$0xff]  ;;  %v301_v6 = vld [vmem:[#allocation5 + $0x48] sm:$0xff]  ;;  %v300_v7 = vld [vmem:[#allocation5 + $0x40] sm:$0xff]  ;;  %s429_s11 = sshll.u32 %s280_s21, 4  ;;  %s431_s27 = sshll.u32 %s427_s7, 4  ;;  %s430_s11 = int_to_ptr.vmem [resolvable:$true] %s429_s11  ;;  %s432_s27 = int_to_ptr.hbm [resolvable:$true] %s431_s27 }
  0x27   : > { %v299_v8 = vld [vmem:[#allocation5 + $0x38] sm:$0xff]  ;;  %v298_v9 = vld [vmem:[#allocation5 + $0x30] sm:$0xff]  ;;  %v297_v10 = vld [vmem:[#allocation5 + $0x28] sm:$0xff]  ;;  %s698_s25 = sshra.s32 %s432_s27, 4  ;;  %s704_s26 = scalar_lea.hbm %s970_s5, 16  ;;  %s699_s25 = int_to_ptr.hbm [resolvable:$true] %s698_s25 }
  0x28   : > { %v296_v11 = vld [vmem:[#allocation5 + $0x20] sm:$0xff]  ;;  %v295_v12 = vld [vmem:[#allocation5 + $0x18] sm:$0xff]  ;;  %v294_v13 = vld [vmem:[#allocation5 + $0x10] sm:$0xff]  ;;  %s700_s29 = scalar_lea.hbm %s699_s25, 8  ;;  %p705_p10 = scmp.lt.s32.totalorder %s699_s25, %s970_s5 }
  0x29   : > { %309 = vmatpush.xpose.msra.mxu0 %v306_v1  ;;  %v293_v14 = vld [vmem:[#allocation5 + $0x8] sm:$0xff]  ;;  %v292_v15 = vld [vmem:[#allocation5] sm:$0xff]  ;;  %v291_v16 = vld [vmem:[%s905_s30] sm:$0xff]  ;;  %s417_s30 = scalar_lea.sflag [#allocation4], %s899_s14  ;;  %p701_p1 = scmp.ne.s32.totalorder %s699_s25, %s700_s29 }
  0x2a   : > { %v615_v17 = vld [vmem:[%s967_s2] ss:$0 sm:$0xff]  ;;  %p706_p11 = scmp.lt.s32.totalorder %s704_s26, %s700_s29 }
  0x2b   : > { %p702_p3 = pnand %p701_p1, %p877_p4 }
  0x2c   : > { %p707_p12 = por %p706_p11, %p705_p10 }
  0x2d   : > { %310 = vmatpush.xpose.msra.mxu0 %v305_v2  ;;  %p703_p9 = pneg %p702_p3 }
  0x2f   : > { %p708_p13 = pnand %p707_p12, %p703_p9 }
  0x31   : > { %311 = vmatpush.xpose.msra.mxu0 %v304_v3 }
  0x35   : > { %312 = vmatpush.xpose.msra.mxu0 %v303_v4 }
  0x39   : > { %313 = vmatpush.xpose.msra.mxu0 %v302_v5 }
  0x3d   : > { %314 = vmatpush.xpose.msra.mxu0 %v301_v6 }
  0x41   : > { %315 = vmatpush.xpose.msra.mxu0 %v300_v7 }
  0x45   : > { %316 = vmatpush.xpose.msra.mxu0 %v299_v8 }
  0x49   : > { %317 = vmatpush.xpose.msra.mxu0 %v298_v9 }
  0x4d   : > { %318 = vmatpush.xpose.msra.mxu0 %v297_v10 }
  0x51   : > { %319 = vmatpush.xpose.msra.mxu0 %v296_v11 }
  0x55   : > { %320 = vmatpush.xpose.msra.mxu0 %v295_v12 }
  0x59   : > { %321 = vmatpush.xpose.msra.mxu0 %v294_v13 }
  0x5d   : > { %322 = vmatpush.xpose.msra.mxu0 %v293_v14 }
  0x61   : > { %323 = vmatpush.xpose.msra.mxu0 %v292_v15  ;;  %v616_v15 = vld [vmem:[%s968_s3] ss:$0 sm:$0xff] }
  0x64   : > { %324 = vmatmul.f32.vlgmr.msra.gmra.mxu0 %v291_v16 }
  0xe1   : > { %v325_v18 = vpop.f32.mrf.mxu0 }
  0xe2   : > { %v328_v19 = vadd.f32 %v615_v17, %v325_v18  ;;  %v617_v17 = vld [vmem:[%s969_s4] ss:$0 sm:$0xff] }
  0xe4   : > { %v335_v20 = vmul.f32 0.70710677, %v328_v19  ;;  %v334_v56 = vmul.f32 0.5, %v328_v19 }
  0xe6   : > { %v336_v21 = vmul.f32 %v335_v20, %v335_v20 }
  0xe8   : > { %v337_v22 = vmin.f32 %v336_v21, 16.0 }
  0xea   : > { %v338_v23 = vmul.f32 2.1237322e-06, %v337_v22  ;;  %v349_v24 = vmul.f32 3.8918573e-05, %v337_v22 }
  0xec   : > { %v339_v25 = vadd.f32 0.00028619796, %v338_v23  ;;  %v350_v26 = vadd.f32 0.001143296, %v349_v24 }
  0xee   : > { %v340_v27 = vmul.f32 %v339_v25, %v337_v22  ;;  %v351_v28 = vmul.f32 %v350_v26, %v337_v22 }
  0xf0   : > { %v352_v29 = vadd.f32 0.014752088, %v351_v28  ;;  %v341_v30 = vadd.f32 0.0036580483, %v340_v27 }
  0xf2   : > { %v353_v31 = vmul.f32 %v352_v29, %v337_v22  ;;  %v342_v33 = vmul.f32 %v341_v30, %v337_v22 }
  0xf4   : > { %v354_v32 = vadd.f32 0.112945676, %v353_v31  ;;  %v343_v36 = vadd.f32 0.05243302, %v342_v33 }
  0xf6   : > { %v355_v34 = vmul.f32 %v354_v32, %v337_v22  ;;  %v344_v39 = vmul.f32 %v343_v36, %v337_v22 }
  0xf8   : > { %v356_v35 = vadd.f32 0.4994258, %v355_v34  ;;  %v345_v40 = vadd.f32 0.18741608, %v344_v39 }
  0xfa   : > { %v357_v37 = vmul.f32 %v356_v35, %v337_v22  ;;  %v346_v42 = vmul.f32 %v345_v40, %v337_v22 }
  0xfc   : > { %v358_v38 = vadd.f32 1.0, %v357_v37  ;;  %v347_v46 = vadd.f32 1.1283791, %v346_v42 }
  0xfe   : > { %618 = vrcp.f32 %v358_v38  ;;  %v370_v45 = vand.u32 2147483648, %v358_v38  ;;  %v368_v48 = vand.u32 2147483647, %v358_v38  ;;  %vm364_vm1 = vweird.f32 %v358_v38 }
  0xff   : > { %v348_v51 = vmul.f32 %v347_v46, %v335_v20  ;;  %620 = vrcp.f32 %v775_v59 }
 0x100   : > { %v371_v50 = vor.u32 1.1754944e-38, %v370_v45  ;;  %vm369_vm3 = vcmp.eq.f32.partialorder %v368_v48, 8.507059e+37 }
 0x104   : > { %v619_v41 = vpop.eup %618 }
 0x105   : > { %v360_v43 = vmul.f32 %v619_v41, %v358_v38  ;;  %vm365_vm0 = vweird.f32 %v619_v41  ;;  %v621_v60 = vpop.eup %620 }
 0x106   : > { %vm366_vm2 = vmor %vm364_vm1, %vm365_vm0  ;;  %v381_v61 = vmul.f32 128.0, %v621_v60  ;;  %vm385_vm4 = vweird.f32 %v621_v60 }
 0x107   : > { %v361_v44 = vsub.f32 1.0, %v360_v43 }
 0x108   : > { %v382_v62 = vsub.f32 1.0, %v381_v61 }
 0x109   : > { %v362_v47 = vmul.f32 %v619_v41, %v361_v44 }
 0x10a   : > { %v383_v63 = vmul.f32 %v621_v60, %v382_v62 }
 0x10b   : > { %v363_v49 = vadd.f32 %v619_v41, %v362_v47 }
 0x10c   : > { %v384_v0 = vadd.f32 %v621_v60, %v383_v63 }
 0x10d   : > { %v367_v52 = vsel %vm366_vm2, %v619_v41, %v363_v49 }
 0x10e   : > { %v372_v53 = vsel %vm369_vm3, %v371_v50, %v367_v52  ;;  %v386_v1 = vsel %vm385_vm4, %v621_v60, %v384_v0 }
 0x10f   : > { %v373_v54 = vmul.f32 %v372_v53, %v348_v51 }
 0x111   : > { %v534_v55 = vclamps-f32 %v373_v54, 1.0 }
 0x113   : > { %v376_v57 = vadd.f32 1.0, %v534_v55 }
 0x115   : > { %v377_v58 = vmul.f32 %v376_v57, %v334_v56 }
 0x117   : > { %378 = vadd.xlane.f32.xlu0 %v377_v58 }
 0x18a   : > { %v379_v2 = vpop.xlane.xlu0 %378 }
 0x18b   : > { %v387_v3 = vmul.f32 %v386_v1, %v379_v2 }
 0x18d   : > { %v388_v4 = vsub.f32 %v377_v58, %v387_v3 }
 0x18f   : > { %v389_v5 = vmul.f32 %v388_v4, %v388_v4 }
 0x191   : > { %390 = vadd.xlane.f32.xlu0 %v389_v5 }
 0x204   : > { %v391_v6 = vpop.xlane.xlu0 %390 }
 0x205   : > { %v392_v7 = vmul.f32 %v391_v6, %v386_v1 }
 0x207   : > { %v393_v8 = vadd.f32 1e-05, %v392_v7 }
 0x209   : > { %622 = vrsqrt.f32 %v393_v8  ;;  %vm400_vm6 = vweird.f32 %v393_v8 }
 0x20f   : > { %v623_v9 = vpop.eup %622 }
 0x210   : > { %v395_v10 = vmul.f32 %v623_v9, %v393_v8  ;;  %vm401_vm5 = vweird.f32 %v623_v9 }
 0x211   : > { %vm402_vm7 = vmor %vm400_vm6, %vm401_vm5 }
 0x212   : > { %v396_v11 = vmul.f32 %v623_v9, %v395_v10 }
 0x214   : > { %v397_v12 = vmul.f32 0.5, %v396_v11 }
 0x216   : > { %v398_v13 = vsub.f32 1.5, %v397_v12 }
 0x218   : > { %v399_v14 = vmul.f32 %v623_v9, %v398_v13 }
 0x21a   : > { %v403_v16 = vsel %vm402_vm7, %v623_v9, %v399_v14 }
 0x21b   : > { %v404_v18 = vmul.f32 %v403_v16, %v388_v4 }
 0x21d   : > { %v409_v19 = vmul.f32 %v616_v15, %v404_v18 }
 0x21f   : > { %v414_v20 = vadd.f32 %v617_v17, %v409_v19 }
 0x221   : > { %415 = vst [vmem:[%s280_s21] sm:$0xff] %v414_v20 }
 0x222   : > { %711 = shalt.err (!%p708_p13)
}
 0x223   : > { %545 = dma.vmem_to_hbm [thread:$0]  (%p877_p4), %s430_s11, 128, %s432_s27, %s417_s30  }
 0x224 PF: > { %s443_s14 = sand.u32 1, %s750_s18   ;;  %p556_p0 = pnand %p527_p6, %p885_p7 }
 0x225   : > { %s444_s24 = scalar_lea.sflag [#allocation4], %s443_s14 }
 0x226   : > { %p557_p2 = pneg %p556_p0 }
 0x228   : > { %745 = dma.done.wait (%p557_p2), %s444_s24, 128  }
 0x229   : > { %747 = vsyncadd (%p557_p2), %s444_s24, 4294967168  ;;  %s22_s23 = sadd.s32 1, %s770_s23   ;;  %s977_s18 = smov %s754_s19 }
 0x22a   : > { %p19_p5 = scmp.ge.s32.totalorder %s22_s23, 4   ;;  %s978_s19 = smov %s758_s20 }
 0x22b   : > { %s979_s20 = smov %s883_s16  ;;  %s980_s21 = smov %s766_s22 }
 0x22c   : > { %s981_s22 = smov %s983_s10  ;;  %21 = sbr.rel (!%p19_p5) target bundleno = 7 (0x7), region = 98 }
 0x231   :  { %450 = vsyncpa [#allocation3], 1 }
 0x232   :  { %452 = vsyncpa [#allocation3 + $0x1], 1 }
 0x233   :  { %453 = vsyncpa [#allocation6], 1 }
 0x234   :  { %454 = vsyncpa [#allocation4], 1 }
 0x235   :  { %456 = vsyncpa [#allocation4 + $0x1], 1 }

</bundles_post_ra>
